<compile_context>
chip_gen: v5e
topology: v5e:2x2
jax: 0.10.0
libtpu: 0.0.40
codegen_flags: <defaults>
</compile_context>

<pallas_src>
import math

import jax
import jax.numpy as jnp
import numpy as np
from jax.experimental import pallas as pl
from jax.experimental.pallas import tpu as pltpu


def _self_attention_kernel(q_ref, k_ref, v_ref,
                           wq_ref, bq_ref,
                           wk_ref, bk_ref,
                           wv_ref, bv_ref,
                           wfc_ref, bfc_ref,
                           out_ref):
    f32 = jnp.float32
    cdt = q_ref.dtype                       # MXU operand dtype (bf16 or f32)
    n_head, d_model, d_k = wq_ref.shape
    lq = q_ref.shape[0]
    lk = k_ref.shape[0]
    scale = 1.0 / math.sqrt(d_k)

    q = q_ref[...]
    k = k_ref[...]
    v = v_ref[...]

    # Broadcast activations over heads once so every contraction below is a single
    # batch-leading batched dot_general: no per-head slices, no transposes, no concat.
    qb = jnp.broadcast_to(q[None], (n_head, lq, d_model))
    kb = jnp.broadcast_to(k[None], (n_head, lk, d_model))
    vb = jnp.broadcast_to(v[None], (n_head, lk, d_model))

    # Per-head projections (MXU, f32 accumulation). Fold 1/sqrt(d_k) into Q once.
    qp = (jnp.einsum('hld,hdk->hlk', qb, wq_ref[...],
                     preferred_element_type=f32) + bq_ref[...]) * scale
    kp = jnp.einsum('hld,hdk->hlk', kb, wk_ref[...],
                    preferred_element_type=f32) + bk_ref[...]
    vp = jnp.einsum('hld,hdk->hlk', vb, wv_ref[...],
                    preferred_element_type=f32) + bv_ref[...]

    # Attention scores for all heads in one batched dot_general (no explicit .T).
    s = jnp.einsum('hqd,hkd->hqk', qp.astype(cdt), kp.astype(cdt),
                   preferred_element_type=f32)

    # Row-wise, numerically stable softmax in f32; denominator on the EUP.
    s = s - jnp.max(s, axis=-1, keepdims=True)
    e = jnp.exp(s)
    attn = e * pl.reciprocal(jnp.sum(e, axis=-1, keepdims=True), approx=True)

    # Weighted values + output projection, still head-batched; then reduce heads.
    o = jnp.einsum('hqk,hkd->hqd', attn.astype(cdt), vp.astype(cdt),
                   preferred_element_type=f32)
    proj = jnp.einsum('hqv,hvD->hqD', o.astype(cdt), wfc_ref[...],
                      preferred_element_type=f32)
    out = jnp.sum(proj, axis=0) + bfc_ref[...]

    out_ref[...] = out.astype(out_ref.dtype)


def self_attention_pallas(q, k, v, params, *, n_head, d_k, d_v,
                          compute_dtype=jnp.bfloat16, lq_tile=None):
    """q, k, v: (B, L, d_model). Returns (B, Lq, d_model) in q.dtype (eval mode, mask=None)."""
    B, Lq, D = q.shape
    _, Lk, _ = k.shape
    wq, bq, wk, bk, wv, bv, wfc, bfc = params

    # Head-major weight layout, prepared once outside the kernel (no in-kernel relayouts).
    wq3 = wq.reshape(D, n_head, d_k).transpose(1, 0, 2).astype(compute_dtype)   # (H, D, d_k)
    wk3 = wk.reshape(D, n_head, d_k).transpose(1, 0, 2).astype(compute_dtype)   # (H, D, d_k)
    wv3 = wv.reshape(D, n_head, d_v).transpose(1, 0, 2).astype(compute_dtype)   # (H, D, d_v)
    wfc3 = wfc.reshape(n_head, d_v, D).astype(compute_dtype)                    # (H, d_v, D)
    bq3 = bq.reshape(n_head, 1, d_k).astype(jnp.float32)
    bk3 = bk.reshape(n_head, 1, d_k).astype(jnp.float32)
    bv3 = bv.reshape(n_head, 1, d_v).astype(jnp.float32)
    bfc2 = bfc.reshape(1, D).astype(jnp.float32)

    qc = q.astype(compute_dtype)
    kc = k.astype(compute_dtype)
    vc = v.astype(compute_dtype)

    # Lq tile: multiple of 8 that divides Lq, capped so tiles fit v7x's 64 MiB VMEM.
    if lq_tile is None:
        lq_tile = 256
    if Lq <= lq_tile or Lq % lq_tile != 0 or lq_tile % 8 != 0:
        lq_tile = Lq
    n_lq = Lq // lq_tile

    def wspec(w):
        return pl.BlockSpec(w.shape, lambda b, i: (0,) * w.ndim)

    return pl.pallas_call(
        _self_attention_kernel,
        out_shape=jax.ShapeDtypeStruct((B, Lq, D), q.dtype),
        grid=(B, n_lq),
        in_specs=[
            pl.BlockSpec((None, lq_tile, D), lambda b, i: (b, i, 0)),   # q tile
            pl.BlockSpec((None, Lk, D), lambda b, i: (b, 0, 0)),        # k (full seq)
            pl.BlockSpec((None, Lk, D), lambda b, i: (b, 0, 0)),        # v (full seq)
            wspec(wq3), wspec(bq3),
            wspec(wk3), wspec(bk3),
            wspec(wv3), wspec(bv3),
            wspec(wfc3), wspec(bfc2),
        ],
        out_specs=pl.BlockSpec((None, lq_tile, D), lambda b, i: (b, i, 0)),
        compiler_params=pltpu.CompilerParams(
            dimension_semantics=("parallel", "parallel"),
        ),
    )(qc, kc, vc, wq3, bq3, wk3, bk3, wv3, bv3, wfc3, bfc2)


def init_params(key, d_model, d_k, d_v, n_head):
    """Deterministic nn.Linear-style init; weights stored as (in, out) for x @ W + b."""
    ks = jax.random.split(key, 8)

    def linear(kw, kb, fan_in, fan_out):
        bound = 1.0 / math.sqrt(fan_in)
        w = jax.random.uniform(kw, (fan_in, fan_out), jnp.float32, -bound, bound)
        b = jax.random.uniform(kb, (1, fan_out), jnp.float32, -bound, bound)
        return w, b

    wq, bq = linear(ks[0], ks[1], d_model, n_head * d_k)
    wk, bk = linear(ks[2], ks[3], d_model, n_head * d_k)
    wv, bv = linear(ks[4], ks[5], d_model, n_head * d_v)
    wfc, bfc = linear(ks[6], ks[7], n_head * d_v, d_model)
    return (wq, bq, wk, bk, wv, bv, wfc, bfc)


def self_attention_reference(q, k, v, params, *, n_head, d_k, d_v):
    """Pure-JAX reference mirroring the PyTorch forward (eval mode, mask=None)."""
    wq, bq, wk, bk, wv, bv, wfc, bfc = params
    B, Lq, D = q.shape
    Lk = k.shape[1]
    qp = (q @ wq + bq).reshape(B, Lq, n_head, d_k).transpose(0, 2, 1, 3)
    kp = (k @ wk + bk).reshape(B, Lk, n_head, d_k).transpose(0, 2, 1, 3)
    vp = (v @ wv + bv).reshape(B, Lk, n_head, d_v).transpose(0, 2, 1, 3)
    attn = jnp.einsum("bhqd,bhkd->bhqk", qp, kp) / math.sqrt(d_k)
    attn = jax.nn.softmax(attn, axis=-1)
    out = jnp.einsum("bhqk,bhkd->bhqd", attn, vp)
    out = out.transpose(0, 2, 1, 3).reshape(B, Lq, n_head * d_v)
    return out @ wfc + bfc


if __name__ == "__main__":
    B, L, d_model = 2, 8, 32
    n_head, d_k, d_v = 2, 16, 16

    key = jax.random.PRNGKey(0)
    kq, kk, kv, kp = jax.random.split(key, 4)
    q = jax.random.normal(kq, (B, L, d_model), jnp.float32)
    k = jax.random.normal(kk, (B, L, d_model), jnp.float32)
    v = jax.random.normal(kv, (B, L, d_model), jnp.float32)
    params = init_params(kp, d_model, d_k, d_v, n_head)

    ref = jax.block_until_ready(
        self_attention_reference(q, k, v, params, n_head=n_head, d_k=d_k, d_v=d_v))

    # f32 operand path (tight check; approx reciprocal in the softmax denominator).
    out_f32 = jax.block_until_ready(
        self_attention_pallas(q, k, v, params, n_head=n_head, d_k=d_k, d_v=d_v,
                              compute_dtype=jnp.float32))
    np.testing.assert_allclose(np.asarray(out_f32), np.asarray(ref), rtol=5e-3, atol=5e-3)

    # bf16 operand / f32 accumulation path (default fast MXU path; looser tolerance).
    out_bf16 = jax.block_until_ready(
        self_attention_pallas(q, k, v, params, n_head=n_head, d_k=d_k, d_v=d_v))
    np.testing.assert_allclose(np.asarray(out_bf16), np.asarray(ref), rtol=6e-2, atol=6e-2)

    print("KERNEL_OK")
</pallas_src>

<mosaic_0001>
module attributes {stable_mosaic.version = 11 : i64} {
  func.func @_self_attention_kernel(%arg0: i32, %arg1: i32, %arg2: memref<1x8x32xf32, #tpu.memory_space<vmem>>, %arg3: memref<1x8x32xf32, #tpu.memory_space<vmem>>, %arg4: memref<1x8x32xf32, #tpu.memory_space<vmem>>, %arg5: memref<2x32x16xf32, #tpu.memory_space<vmem>>, %arg6: memref<2x1x16xf32, #tpu.memory_space<vmem>>, %arg7: memref<2x32x16xf32, #tpu.memory_space<vmem>>, %arg8: memref<2x1x16xf32, #tpu.memory_space<vmem>>, %arg9: memref<2x32x16xf32, #tpu.memory_space<vmem>>, %arg10: memref<2x1x16xf32, #tpu.memory_space<vmem>>, %arg11: memref<2x16x32xf32, #tpu.memory_space<vmem>>, %arg12: memref<1x32xf32, #tpu.memory_space<vmem>>, %arg13: memref<1x8x32xf32, #tpu.memory_space<vmem>>) attributes {dimension_semantics = [#tpu.dimension_semantics<parallel>, #tpu.dimension_semantics<parallel>], iteration_bounds = array<i64: 2, 1>, scalar_prefetch = 0 : i64, scratch_operands = 0 : i64, tpu.core_type = #tpu.core_type<tc>, window_params = [{transform_indices = @transform_0, window_bounds = array<i64: 1, 8, 32>}, {transform_indices = @transform_1, window_bounds = array<i64: 1, 8, 32>}, {transform_indices = @transform_2, window_bounds = array<i64: 1, 8, 32>}, {pipeline_mode = #tpu.pipeline_mode<synchronous>, transform_indices = @transform_3, window_bounds = array<i64: 2, 32, 16>}, {pipeline_mode = #tpu.pipeline_mode<synchronous>, transform_indices = @transform_4, window_bounds = array<i64: 2, 1, 16>}, {pipeline_mode = #tpu.pipeline_mode<synchronous>, transform_indices = @transform_5, window_bounds = array<i64: 2, 32, 16>}, {pipeline_mode = #tpu.pipeline_mode<synchronous>, transform_indices = @transform_6, window_bounds = array<i64: 2, 1, 16>}, {pipeline_mode = #tpu.pipeline_mode<synchronous>, transform_indices = @transform_7, window_bounds = array<i64: 2, 32, 16>}, {pipeline_mode = #tpu.pipeline_mode<synchronous>, transform_indices = @transform_8, window_bounds = array<i64: 2, 1, 16>}, {pipeline_mode = #tpu.pipeline_mode<synchronous>, transform_indices = @transform_9, window_bounds = array<i64: 2, 16, 32>}, {pipeline_mode = #tpu.pipeline_mode<synchronous>, transform_indices = @transform_10, window_bounds = array<i64: 1, 32>}, {transform_indices = @transform_11, window_bounds = array<i64: 1, 8, 32>}]} {
    %c0 = arith.constant 0 : index
    %c0_0 = arith.constant 0 : index
    %c0_1 = arith.constant 0 : index
    %0 = vector.load %arg2[%c0, %c0_0, %c0_1] : memref<1x8x32xf32, #tpu.memory_space<vmem>>, vector<1x8x32xf32>
    %1 = vector.shape_cast %0 : vector<1x8x32xf32> to vector<8x32xf32>
    %c0_2 = arith.constant 0 : index
    %c0_3 = arith.constant 0 : index
    %c0_4 = arith.constant 0 : index
    %2 = vector.load %arg3[%c0_2, %c0_3, %c0_4] : memref<1x8x32xf32, #tpu.memory_space<vmem>>, vector<1x8x32xf32>
    %3 = vector.shape_cast %2 : vector<1x8x32xf32> to vector<8x32xf32>
    %c0_5 = arith.constant 0 : index
    %c0_6 = arith.constant 0 : index
    %c0_7 = arith.constant 0 : index
    %4 = vector.load %arg4[%c0_5, %c0_6, %c0_7] : memref<1x8x32xf32, #tpu.memory_space<vmem>>, vector<1x8x32xf32>
    %5 = vector.shape_cast %4 : vector<1x8x32xf32> to vector<8x32xf32>
    %6 = vector.shape_cast %1 : vector<8x32xf32> to vector<1x8x32xf32>
    %7 = vector.shape_cast %6 : vector<1x8x32xf32> to vector<1x8x32xf32>
    %8 = vector.broadcast %7 : vector<1x8x32xf32> to vector<2x8x32xf32>
    %9 = vector.shape_cast %3 : vector<8x32xf32> to vector<1x8x32xf32>
    %10 = vector.shape_cast %9 : vector<1x8x32xf32> to vector<1x8x32xf32>
    %11 = vector.broadcast %10 : vector<1x8x32xf32> to vector<2x8x32xf32>
    %12 = vector.shape_cast %5 : vector<8x32xf32> to vector<1x8x32xf32>
    %13 = vector.shape_cast %12 : vector<1x8x32xf32> to vector<1x8x32xf32>
    %14 = vector.broadcast %13 : vector<1x8x32xf32> to vector<2x8x32xf32>
    %c0_8 = arith.constant 0 : index
    %c0_9 = arith.constant 0 : index
    %c0_10 = arith.constant 0 : index
    %15 = vector.load %arg5[%c0_8, %c0_9, %c0_10] : memref<2x32x16xf32, #tpu.memory_space<vmem>>, vector<2x32x16xf32>
    "tpu.trace_start"() <{level = 10 : i32, message = "hld,hdk->hlk"}> : () -> ()
    %cst = arith.constant dense<0.000000e+00> : vector<2x8x16xf32>
    %16 = tpu.matmul %8, %15, %cst {dimension_numbers = #tpu.dot_dimension_numbers<[2], [1], [1], [2], [0, 0, 0, 1, 1, 2], [0], [0]>} : vector<2x8x32xf32>, vector<2x32x16xf32>, vector<2x8x16xf32> -> vector<2x8x16xf32>
    "tpu.trace_stop"() : () -> ()
    %c0_11 = arith.constant 0 : index
    %c0_12 = arith.constant 0 : index
    %c0_13 = arith.constant 0 : index
    %17 = vector.load %arg6[%c0_11, %c0_12, %c0_13] : memref<2x1x16xf32, #tpu.memory_space<vmem>>, vector<2x1x16xf32>
    %18 = vector.broadcast %17 : vector<2x1x16xf32> to vector<2x8x16xf32>
    %19 = arith.addf %16, %18 : vector<2x8x16xf32>
    %cst_14 = arith.constant 2.500000e-01 : f32
    %20 = vector.broadcast %cst_14 : f32 to vector<2x8x16xf32>
    %21 = arith.mulf %19, %20 : vector<2x8x16xf32>
    %c0_15 = arith.constant 0 : index
    %c0_16 = arith.constant 0 : index
    %c0_17 = arith.constant 0 : index
    %22 = vector.load %arg7[%c0_15, %c0_16, %c0_17] : memref<2x32x16xf32, #tpu.memory_space<vmem>>, vector<2x32x16xf32>
    "tpu.trace_start"() <{level = 10 : i32, message = "hld,hdk->hlk"}> : () -> ()
    %cst_18 = arith.constant dense<0.000000e+00> : vector<2x8x16xf32>
    %23 = tpu.matmul %11, %22, %cst_18 {dimension_numbers = #tpu.dot_dimension_numbers<[2], [1], [1], [2], [0, 0, 0, 1, 1, 2], [0], [0]>} : vector<2x8x32xf32>, vector<2x32x16xf32>, vector<2x8x16xf32> -> vector<2x8x16xf32>
    "tpu.trace_stop"() : () -> ()
    %c0_19 = arith.constant 0 : index
    %c0_20 = arith.constant 0 : index
    %c0_21 = arith.constant 0 : index
    %24 = vector.load %arg8[%c0_19, %c0_20, %c0_21] : memref<2x1x16xf32, #tpu.memory_space<vmem>>, vector<2x1x16xf32>
    %25 = vector.broadcast %24 : vector<2x1x16xf32> to vector<2x8x16xf32>
    %26 = arith.addf %23, %25 : vector<2x8x16xf32>
    %c0_22 = arith.constant 0 : index
    %c0_23 = arith.constant 0 : index
    %c0_24 = arith.constant 0 : index
    %27 = vector.load %arg9[%c0_22, %c0_23, %c0_24] : memref<2x32x16xf32, #tpu.memory_space<vmem>>, vector<2x32x16xf32>
    "tpu.trace_start"() <{level = 10 : i32, message = "hld,hdk->hlk"}> : () -> ()
    %cst_25 = arith.constant dense<0.000000e+00> : vector<2x8x16xf32>
    %28 = tpu.matmul %14, %27, %cst_25 {dimension_numbers = #tpu.dot_dimension_numbers<[2], [1], [1], [2], [0, 0, 0, 1, 1, 2], [0], [0]>} : vector<2x8x32xf32>, vector<2x32x16xf32>, vector<2x8x16xf32> -> vector<2x8x16xf32>
    "tpu.trace_stop"() : () -> ()
    %c0_26 = arith.constant 0 : index
    %c0_27 = arith.constant 0 : index
    %c0_28 = arith.constant 0 : index
    %29 = vector.load %arg10[%c0_26, %c0_27, %c0_28] : memref<2x1x16xf32, #tpu.memory_space<vmem>>, vector<2x1x16xf32>
    %30 = vector.broadcast %29 : vector<2x1x16xf32> to vector<2x8x16xf32>
    %31 = arith.addf %28, %30 : vector<2x8x16xf32>
    "tpu.trace_start"() <{level = 10 : i32, message = "hqd,hkd->hqk"}> : () -> ()
    %cst_29 = arith.constant dense<0.000000e+00> : vector<2x8x8xf32>
    %32 = tpu.matmul %21, %26, %cst_29 {dimension_numbers = #tpu.dot_dimension_numbers<[2], [2], [1], [1], [0, 0, 0, 1, 1, 1], [0], [0]>} : vector<2x8x16xf32>, vector<2x8x16xf32>, vector<2x8x8xf32> -> vector<2x8x8xf32>
    "tpu.trace_stop"() : () -> ()
    %cst_30 = arith.constant dense<0xFF800000> : vector<2x8xf32>
    %33 = vector.multi_reduction <maximumf>, %32, %cst_30 [2] : vector<2x8x8xf32> to vector<2x8xf32>
    %34 = vector.shape_cast %33 : vector<2x8xf32> to vector<2x8x1xf32>
    %35 = vector.broadcast %34 : vector<2x8x1xf32> to vector<2x8x8xf32>
    %36 = arith.subf %32, %35 : vector<2x8x8xf32>
    %37 = math.exp %36 : vector<2x8x8xf32>
    %cst_31 = arith.constant dense<0.000000e+00> : vector<2x8xf32>
    %38 = vector.multi_reduction <add>, %37, %cst_31 [2] : vector<2x8x8xf32> to vector<2x8xf32>
    %39 = vector.shape_cast %38 : vector<2x8xf32> to vector<2x8x1xf32>
    %40 = tpu.reciprocal %39 {approx = true} : vector<2x8x1xf32> -> vector<2x8x1xf32>
    %41 = vector.broadcast %40 : vector<2x8x1xf32> to vector<2x8x8xf32>
    %42 = arith.mulf %37, %41 : vector<2x8x8xf32>
    "tpu.trace_start"() <{level = 10 : i32, message = "hqk,hkd->hqd"}> : () -> ()
    %cst_32 = arith.constant dense<0.000000e+00> : vector<2x8x16xf32>
    %43 = tpu.matmul %42, %31, %cst_32 {dimension_numbers = #tpu.dot_dimension_numbers<[2], [1], [1], [2], [0, 0, 0, 1, 1, 2], [0], [0]>} : vector<2x8x8xf32>, vector<2x8x16xf32>, vector<2x8x16xf32> -> vector<2x8x16xf32>
    "tpu.trace_stop"() : () -> ()
    %c0_33 = arith.constant 0 : index
    %c0_34 = arith.constant 0 : index
    %c0_35 = arith.constant 0 : index
    %44 = vector.load %arg11[%c0_33, %c0_34, %c0_35] : memref<2x16x32xf32, #tpu.memory_space<vmem>>, vector<2x16x32xf32>
    "tpu.trace_start"() <{level = 10 : i32, message = "hqv,hvD->hqD"}> : () -> ()
    %cst_36 = arith.constant dense<0.000000e+00> : vector<2x8x32xf32>
    %45 = tpu.matmul %43, %44, %cst_36 {dimension_numbers = #tpu.dot_dimension_numbers<[2], [1], [1], [2], [0, 0, 0, 1, 1, 2], [0], [0]>} : vector<2x8x16xf32>, vector<2x16x32xf32>, vector<2x8x32xf32> -> vector<2x8x32xf32>
    "tpu.trace_stop"() : () -> ()
    %cst_37 = arith.constant dense<0.000000e+00> : vector<8x32xf32>
    %46 = vector.multi_reduction <add>, %45, %cst_37 [0] : vector<2x8x32xf32> to vector<8x32xf32>
    %c0_38 = arith.constant 0 : index
    %c0_39 = arith.constant 0 : index
    %47 = vector.load %arg12[%c0_38, %c0_39] : memref<1x32xf32, #tpu.memory_space<vmem>>, vector<1x32xf32>
    %48 = vector.broadcast %47 : vector<1x32xf32> to vector<8x32xf32>
    %49 = arith.addf %46, %48 : vector<8x32xf32>
    %c0_40 = arith.constant 0 : index
    %c0_41 = arith.constant 0 : index
    %c0_42 = arith.constant 0 : index
    %50 = vector.load %arg13[%c0_40, %c0_41, %c0_42] : memref<1x8x32xf32, #tpu.memory_space<vmem>>, vector<1x8x32xf32>
    %51 = vector.shape_cast %50 : vector<1x8x32xf32> to vector<8x32xf32>
    %52 = vector.shape_cast %49 : vector<8x32xf32> to vector<1x8x32xf32>
    tpu.vector_store %arg13[%c0_40, %c0_41, %c0_42], %52 {strides = array<i32>} : memref<1x8x32xf32, #tpu.memory_space<vmem>>, vector<1x8x32xf32>,
    return
  }
  func.func @transform_0(%arg0: i32, %arg1: i32) -> (i32, i32, i32) {
    %c0_i32 = arith.constant 0 : i32
    %c0_i32_0 = arith.constant 0 : i32
    return %arg0, %arg1, %c0_i32 : i32, i32, i32
  }
  func.func @transform_1(%arg0: i32, %arg1: i32) -> (i32, i32, i32) {
    %c0_i32 = arith.constant 0 : i32
    %c0_i32_0 = arith.constant 0 : i32
    %c0_i32_1 = arith.constant 0 : i32
    return %arg0, %c0_i32, %c0_i32_0 : i32, i32, i32
  }
  func.func @transform_2(%arg0: i32, %arg1: i32) -> (i32, i32, i32) {
    %c0_i32 = arith.constant 0 : i32
    %c0_i32_0 = arith.constant 0 : i32
    %c0_i32_1 = arith.constant 0 : i32
    return %arg0, %c0_i32, %c0_i32_0 : i32, i32, i32
  }
  func.func @transform_3(%arg0: i32, %arg1: i32) -> (i32, i32, i32) {
    %c0_i32 = arith.constant 0 : i32
    %c0_i32_0 = arith.constant 0 : i32
    %c0_i32_1 = arith.constant 0 : i32
    %c0_i32_2 = arith.constant 0 : i32
    return %c0_i32, %c0_i32_0, %c0_i32_1 : i32, i32, i32
  }
  func.func @transform_4(%arg0: i32, %arg1: i32) -> (i32, i32, i32) {
    %c0_i32 = arith.constant 0 : i32
    %c0_i32_0 = arith.constant 0 : i32
    %c0_i32_1 = arith.constant 0 : i32
    %c0_i32_2 = arith.constant 0 : i32
    return %c0_i32, %c0_i32_0, %c0_i32_1 : i32, i32, i32
  }
  func.func @transform_5(%arg0: i32, %arg1: i32) -> (i32, i32, i32) {
    %c0_i32 = arith.constant 0 : i32
    %c0_i32_0 = arith.constant 0 : i32
    %c0_i32_1 = arith.constant 0 : i32
    %c0_i32_2 = arith.constant 0 : i32
    return %c0_i32, %c0_i32_0, %c0_i32_1 : i32, i32, i32
  }
  func.func @transform_6(%arg0: i32, %arg1: i32) -> (i32, i32, i32) {
    %c0_i32 = arith.constant 0 : i32
    %c0_i32_0 = arith.constant 0 : i32
    %c0_i32_1 = arith.constant 0 : i32
    %c0_i32_2 = arith.constant 0 : i32
    return %c0_i32, %c0_i32_0, %c0_i32_1 : i32, i32, i32
  }
  func.func @transform_7(%arg0: i32, %arg1: i32) -> (i32, i32, i32) {
    %c0_i32 = arith.constant 0 : i32
    %c0_i32_0 = arith.constant 0 : i32
    %c0_i32_1 = arith.constant 0 : i32
    %c0_i32_2 = arith.constant 0 : i32
    return %c0_i32, %c0_i32_0, %c0_i32_1 : i32, i32, i32
  }
  func.func @transform_8(%arg0: i32, %arg1: i32) -> (i32, i32, i32) {
    %c0_i32 = arith.constant 0 : i32
    %c0_i32_0 = arith.constant 0 : i32
    %c0_i32_1 = arith.constant 0 : i32
    %c0_i32_2 = arith.constant 0 : i32
    return %c0_i32, %c0_i32_0, %c0_i32_1 : i32, i32, i32
  }
  func.func @transform_9(%arg0: i32, %arg1: i32) -> (i32, i32, i32) {
    %c0_i32 = arith.constant 0 : i32
    %c0_i32_0 = arith.constant 0 : i32
    %c0_i32_1 = arith.constant 0 : i32
    %c0_i32_2 = arith.constant 0 : i32
    return %c0_i32, %c0_i32_0, %c0_i32_1 : i32, i32, i32
  }
  func.func @transform_10(%arg0: i32, %arg1: i32) -> (i32, i32) {
    %c0_i32 = arith.constant 0 : i32
    %c0_i32_0 = arith.constant 0 : i32
    %c0_i32_1 = arith.constant 0 : i32
    return %c0_i32, %c0_i32_0 : i32, i32
  }
  func.func @transform_11(%arg0: i32, %arg1: i32) -> (i32, i32, i32) {
    %c0_i32 = arith.constant 0 : i32
    %c0_i32_0 = arith.constant 0 : i32
    return %arg0, %arg1, %c0_i32 : i32, i32, i32
  }
}

</mosaic_0001>

<bundles_post_ra>
// kernel: tpu_custom_call.1
= control target key start
LH: loop header
LB: loop body
LE: loop exit
PB: predicated region body
PF: predicated region fallthrough
CT: control target
= control target key end

     0   :  { %16 = vsyncpa [#allocation3], 0  ;;  %s1388_s0 = inlined_call_operand.vmem [shape: f32[2,8,32], index: 0, kind: input, shape index: {}]   ;;  %s1389_s1 = inlined_call_operand.vmem [shape: f32[2,8,32], index: 1, kind: input, shape index: {}]   ;;  %s1390_s2 = inlined_call_operand.vmem [shape: f32[2,8,32], index: 2, kind: input, shape index: {}]   ;;  %s1391_s3 = inlined_call_operand.vmem [shape: f32[2,32,16], index: 3, kind: input, shape index: {}]   ;;  %s1392_s4 = inlined_call_operand.vmem [shape: f32[2,1,16], index: 4, kind: input, shape index: {}]   ;;  %s1393_s5 = inlined_call_operand.vmem [shape: f32[2,32,16], index: 5, kind: input, shape index: {}]   ;;  %s1394_s6 = inlined_call_operand.vmem [shape: f32[2,1,16], index: 6, kind: input, shape index: {}]   ;;  %s1395_s7 = inlined_call_operand.vmem [shape: f32[2,32,16], index: 7, kind: input, shape index: {}]   ;;  %s1396_s8 = inlined_call_operand.vmem [shape: f32[2,1,16], index: 8, kind: input, shape index: {}]   ;;  %s1397_s9 = inlined_call_operand.vmem [shape: f32[2,16,32], index: 9, kind: input, shape index: {}]   ;;  %s1398_s10 = inlined_call_operand.vmem [shape: f32[1,32], index: 10, kind: input, shape index: {}]   ;;  %s1399_s11 = inlined_call_operand.hbm [shape: f32[2,8,32], index: 11, kind: output, shape index: {}]  }
   0x1   :  { %18 = vsyncpa [#allocation3 + $0x1], 0  ;;  %s1154_s17 = smov 0   ;;  %s1156_s18 = smov 0  }
   0x2   :  { %s1158_s19 = smov 0   ;;  %s1160_s20 = smov 0  }
   0x3   :  { %s1162_s21 = smov 0   ;;  %s1164_s22 = smov 0  }
   0x4 LB: > { %1403 = sst [smem:[#allocation5_spill]] %s1080_s19  ;;  %s917_s23 = sadd.s32 4294967295, %s1092_s22   ;;  %s1092_s22 = sphi %s1164_s22, %s24_s22   ;;  %s1088_s21 = sphi %s1162_s21, %s1412_s21   ;;  %s1084_s20 = sphi %s1160_s20, %s1411_s20   ;;  %s1080_s19 = sphi %s1158_s19, %s1410_s19   ;;  %s1076_s18 = sphi %s1156_s18, %s1414_s18   ;;  %s1072_s17 = sphi %s1154_s17, %s1413_s17  }
   0x5   : > { %1404 = sst [smem:[#allocation6_spill]] %s1088_s21  ;;  %s918_s24 = sadd.s32 4294967294, %s1092_s22  }
   0x6   : > { %s36_s25 = sadd.s32 1, %s1088_s21  ;;  %s293_s26 = sadd.s32 1, %s1080_s19 }
   0x7   : > { %p38_p0 = scmp.ge.s32.totalorder %s36_s25, 2  ;;  %p303_p1 = scmp.ne.s32.totalorder %s1080_s19, %s1076_s18 }
   0x8   : > { %p304_p2 = scmp.eq.s32.totalorder %s917_s23, 1  ;;  %p309_p3 = scmp.ne.s32.totalorder %s1076_s18, %s1072_s17 }
   0x9   : > { %s1416_s25 = smov (%p38_p0, %s36_s25), 0  ;;  %p310_p5 = scmp.eq.s32.totalorder %s918_s24, 1 }
   0xa   : > { %1405 = sst [smem:[#allocation7_spill]] %s1416_s25  ;;  %p1194_p4 = por %p304_p2, %p303_p1 }
   0xb   : > { %s288_s28 = ssub.s32 %s1088_s21, %s1416_s25  ;;  %p921_p6 = scmp.ge.s32.totalorder %s1092_s22, 1 }
   0xc   : > { %p291_p7 = scmp.eq.s32.totalorder %s288_s28, 0  ;;  %p1201_p8 = por %p310_p5, %p309_p3 }
   0xd   : > { %p376_p9 = scmp.lt.s32.totalorder %s1092_s22, 3 }
   0xe   : > { %s1207_s30 = scalar_select %p291_p7, %s1080_s19, %s293_s26  }
   0xf   : > { %p377_p10 = pnand %p921_p6, %p376_p9 }
  0x10   : > { %1408 = sst [smem:[#allocation8_spill]] %s1207_s30  ;;  %p426_p11 = scmp.lt.s32.totalorder (!%p377_p10), %s1084_s20, 1 }
  0x11   : > { %380 = sbr.rel (%p377_p10) target bundleno = 827 (0x33b), region = 64 }
  0x16   : > { %v509_v0 = vld [vmem:[%s1393_s5 + $0x18] sm:$0xff]  ;;  %v508_v1 = vld [vmem:[%s1393_s5 + $0x10] sm:$0xff]  ;;  %v507_v4 = vld [vmem:[%s1393_s5 + $0x8] sm:$0xff]  ;;  %s427_s12 = scalar_select %p426_p11, %s1084_s20, 1  ;;  %vm460_vm0 = vcmask 261120   ;;  %vm624_vm1 = vcmask 130048  }
  0x17   : > { %537 = vmatpush.msra.mxu2 %v509_v0  ;;  %v447_v2 = vld [vmem:[%s1391_s3 + $0x18] sm:$0xff]  ;;  %v446_v5 = vld [vmem:[%s1391_s3 + $0x10] sm:$0xff]  ;;  %v506_v7 = vld [vmem:[%s1393_s5] sm:$0xff]  ;;  %vm677_vm2 = vcmask 64512  }
  0x18   : > { %v513_v3 = vld [vmem:[%s1393_s5 + $0x38] sm:$0xff]  ;;  %476 = vmatpush.msra.mxu0 %v447_v2  ;;  %v512_v6 = vld [vmem:[%s1393_s5 + $0x30] sm:$0xff]  ;;  %v445_v8 = vld [vmem:[%s1391_s3 + $0x8] sm:$0xff]  ;;  %s1241_s30 = sshll.u32 %s427_s12, 3  ;;  %s423_s12 = sand.u32 1, %s1076_s18  }
  0x19   : > { %557 = vmatpush.msra.mxu3 %v513_v3  ;;  %538 = vmatpush.msra.mxu2 %v508_v1  ;;  %v511_v9 = vld [vmem:[%s1393_s5 + $0x28] sm:$0xff]  ;;  %v444_v10 = vld [vmem:[%s1391_s3] sm:$0xff]  ;;  %v451_v11 = vld [vmem:[%s1391_s3 + $0x38] sm:$0xff]  ;;  %s436_s26 = scalar_lea.vmem %s1389_s1, %s1241_s30  ;;  %s432_s19 = scalar_lea.vmem %s1388_s0, %s1241_s30 }
  0x1a   : > { %477 = vmatpush.msra.mxu0 %v446_v5  ;;  %v450_v12 = vld [vmem:[%s1391_s3 + $0x30] sm:$0xff]  ;;  %v510_v13 = vld [vmem:[%s1393_s5 + $0x20] sm:$0xff]  ;;  %496 = vmatpush.msra.mxu1 %v451_v11  ;;  %v449_v14 = vld [vmem:[%s1391_s3 + $0x28] sm:$0xff]  ;;  %s440_s14 = scalar_lea.vmem %s1390_s2, %s1241_s30  ;;  %s922_s30 = sshll.u32 %s423_s12, 3 }
  0x1b   : > { %558 = vmatpush.msra.mxu3 %v512_v6  ;;  %539 = vmatpush.msra.mxu2 %v507_v4  ;;  %v442_v15 = vld [vmem:[%s436_s26] sm:$0xff]  ;;  %v568_v36 = vld [vmem:[%s1395_s7 + $0x18] sm:$0xff]  ;;  %v567_v37 = vld [vmem:[%s1395_s7 + $0x10] sm:$0xff]  ;;  %s941_s26 = sshll.u32 %s1084_s20, 3  ;;  %s425_s15 = scalar_lea.vmem [#allocation2], %s922_s30 }
  0x1c   : > { %478 = vmatpush.msra.mxu0 %v445_v8  ;;  %v441_v16 = vld [vmem:[%s432_s19] sm:$0xff]  ;;  %497 = vmatpush.msra.mxu1 %v450_v12  ;;  %v566_v38 = vld [vmem:[%s1395_s7 + $0x8] sm:$0xff]  ;;  %v572_v40 = vld [vmem:[%s1395_s7 + $0x38] sm:$0xff]  ;;  %s817_s21 = scalar_lea.hbm %s1399_s11, %s941_s26  ;;  %s819_s16 = sshll.u32 %s425_s15, 4  ;;  %s820_s16 = int_to_ptr.vmem [resolvable:$true] %s819_s16 }
  0x1d   : > { %559 = vmatpush.msra.mxu3 %v511_v9  ;;  %540 = vmatpush.msra.mxu2 %v506_v7  ;;  %v448_v17 = vld [vmem:[%s1391_s3 + $0x20] sm:$0xff]  ;;  %v571_v42 = vld [vmem:[%s1395_s7 + $0x30] sm:$0xff]  ;;  %v570_v43 = vld [vmem:[%s1395_s7 + $0x28] sm:$0xff]  ;;  %s821_s23 = sshll.u32 %s817_s21, 4  ;;  %s806_s20 = scalar_lea.sflag [#allocation3], %s423_s12  ;;  %s822_s23 = int_to_ptr.hbm [resolvable:$true] %s821_s23 }
  0x1e   : > { %928 = vmatmul.msk.f32.vlgmr.msra.gmra.mxu2 %vm460_vm0, %v442_v15  ;;  %479 = vmatpush.msra.mxu0 %v444_v10  ;;  %v1000_v18 = vld [vmem:[%s1392_s4] ss:$0 sm:$0xff]  ;;  %v1002_v20 = vld [vmem:[%s1392_s4 + $0x1] ss:$0 sm:$0xff]  ;;  %v747_v61 = vld [vmem:[%s1397_s9 + $0x8] sm:$0xff]  ;;  %s1028_s24 = sshra.s32 %s822_s23, 4  ;;  %s1029_s24 = int_to_ptr.hbm [resolvable:$true] %s1028_s24 }
  0x1f   : > { %926 = vmatmul.msk.f32.vlgmr.msra.gmra.mxu0 %vm460_vm0, %v441_v16  ;;  %560 = vmatpush.msra.mxu3 %v510_v13  ;;  %v999_v21 = vld [vmem:[%s1394_s6] ss:$0 sm:$0xff]  ;;  %v1001_v23 = vld [vmem:[%s1394_s6 + $0x1] ss:$0 sm:$0xff]  ;;  %v749_v5 = vld [vmem:[%s1397_s9 + $0x18] sm:$0xff]  ;;  %s1030_s19 = scalar_lea.hbm %s1029_s24, 8  ;;  %p1035_p1 = scmp.lt.s32.totalorder %s1029_s24, %s1399_s11 }
  0x20   : > { %929 = vmatmul.msk.f32.vlgmr.msra.gmra.mxu3 %vm460_vm0, %v442_v15  ;;  %498 = vmatpush.msra.mxu1 %v449_v14  ;;  %v565_v39 = vld [vmem:[%s1395_s7] sm:$0xff]  ;;  %v748_v6 = vld [vmem:[%s1397_s9 + $0x10] sm:$0xff]  ;;  %p1031_p12 = scmp.ne.s32.totalorder %s1029_s24, %s1030_s19  ;;  %s1034_s30 = scalar_lea.hbm %s1399_s11, 16 }
  0x21   : > { %596 = vmatpush.msrb.mxu0 %v568_v36  ;;  %v443_v41 = vld [vmem:[%s440_s14] sm:$0xff]  ;;  %p1036_p2 = scmp.lt.s32.totalorder %s1034_s30, %s1030_s19 }
  0x22   : > { %499 = vmatpush.msra.mxu1 %v448_v17  ;;  %v569_v44 = vld [vmem:[%s1395_s7 + $0x20] sm:$0xff]  ;;  %p1032_p13 = pnand %p1031_p12, %p1194_p4 }
  0x23   : > { %927 = vmatmul.msk.f32.vlgmr.msra.gmra.mxu1 %vm460_vm0, %v441_v16  ;;  %597 = vmatpush.msrb.mxu0 %v567_v37  ;;  %v1003_v55 = vld [vmem:[%s1396_s8] ss:$0 sm:$0xff]  ;;  %v1004_v58 = vld [vmem:[%s1396_s8 + $0x1] ss:$0 sm:$0xff]  ;;  %p1037_p3 = por %p1036_p2, %p1035_p1 }
  0x24   : > { %616 = vmatpush.msrb.mxu1 %v572_v40  ;;  %v746_v4 = vld [vmem:[%s1397_s9] sm:$0xff]  ;;  %p1033_p0 = pneg %p1032_p13 }
  0x25   : > { %598 = vmatpush.msrb.mxu0 %v566_v38  ;;  %v1005_v11 = vld [vmem:[%s1398_s10] ss:$0 sm:$0xff] }
  0x26   : > { %617 = vmatpush.msrb.mxu1 %v571_v42  ;;  %p1038_p5 = pnand %p1037_p3, %p1033_p0 }
  0x27   : > { %599 = vmatpush.msrb.mxu0 %v565_v39 }
  0x28   : > { %930 = vmatmul.msk.f32.vlgmr.msrb.gmra.mxu0 %vm460_vm0, %v443_v41  ;;  %618 = vmatpush.msrb.mxu1 %v570_v43 }
  0x2a   : > { %619 = vmatpush.msrb.mxu1 %v569_v44 }
  0x2b   : > { %931 = vmatmul.msk.f32.vlgmr.msrb.gmra.mxu1 %vm460_vm0, %v443_v41 }
  0x9c   : > { %v481_v19 = vpop.f32.mrf.mxu0 }
  0x9d   : > { %v482_v22 = vadd.f32 %v1000_v18, %v481_v19 }
  0x9f   : > { %v504_v28 = vmul.f32 0.25, %v482_v22 }
  0xa0   : > { %v501_v24 = vpop.f32.mrf.mxu1 }
  0xa1   : > { %v542_v25 = vpop.f32.mrf.mxu2  ;;  %v502_v26 = vadd.f32 %v1002_v20, %v501_v24 }
  0xa2   : > { %v543_v27 = vadd.f32 %v999_v21, %v542_v25 }
  0xa3   : > { %v562_v29 = vpop.f32.mrf.mxu3  ;;  %v505_v31 = vmul.f32 0.25, %v502_v26 }
  0xa4   : > { %932 = vmatpush.xpose.msk.msrb.mxu2 %vm624_vm1, %v543_v27  ;;  %v563_v30 = vadd.f32 %v1001_v23, %v562_v29 }
  0xa5   : > { %v601_v56 = vpop.f32.mrf.mxu0 }
  0xa6   : > { %934 = vmatpush.xpose.msk.msrb.mxu3 %vm624_vm1, %v563_v30  ;;  %v602_v57 = vadd.f32 %v1003_v55, %v601_v56 }
  0xa7   : > { %933 = vmatmul.msk.f32.vlgmr.msrb.gmra.mxu2 %vm624_vm1, %v504_v28 }
  0xa8   : > { %718 = vmatpush.msra.mxu0 %v602_v57  ;;  %v621_v59 = vpop.f32.mrf.mxu1  ;;  %767 = vmatpush.msra.mxu2 %v747_v61 }
  0xa9   : > { %935 = vmatmul.msk.f32.vlgmr.msrb.gmra.mxu3 %vm624_vm1, %v505_v31  ;;  %v622_v60 = vadd.f32 %v1004_v58, %v621_v59 }
  0xaa   : > { %768 = vmatpush.msra.mxu2 %v746_v4  ;;  %790 = vmatpush.msra.mxu3 %v749_v5 }
  0xab   : > { %741 = vmatpush.msra.mxu1 %v622_v60 }
  0xac   : > { %791 = vmatpush.msra.mxu3 %v748_v6 }
 0x12a   : > { %v648_v32 = vpop.f32.mrf.mxu2 }
 0x12b   : > { %v678_v33 = vsel %vm677_vm2, %v648_v32, -inf }
 0x12c   : > { %679 = vmax.xlane.f32.xlu0 %v678_v33  ;;  %v674_v34 = vpop.f32.mrf.mxu3 }
 0x12d   : > { %v681_v35 = vsel %vm677_vm2, %v674_v34, -inf }
 0x134   : > { %682 = vmax.xlane.f32.xlu0 %v681_v35 }
 0x19f   : > { %v680_v45 = vpop.xlane.xlu0 %679 }
 0x1a0   : > { %v684_v46 = vsub.f32 %v648_v32, %v680_v45 }
 0x1a2   : > { %v686_v47 = vmul.f32 1.442695, %v684_v46 }
 0x1a4   : > { %1006 = vpow2.f32 %v686_v47 }
 0x1a7   : > { %v683_v48 = vpop.xlane.xlu0 %682 }
 0x1a8   : > { %v685_v49 = vsub.f32 %v674_v34, %v683_v48 }
 0x1aa   : > { %v1007_v50 = vpop.eup %1006  ;;  %v688_v51 = vmul.f32 1.442695, %v685_v49 }
 0x1ab   : > { %v690_v52 = vsel %vm677_vm2, %v1007_v50, 0.0 }
 0x1ac   : > { %1008 = vpow2.f32 %v688_v51  ;;  %691 = vadd.xlane.f32.xlu1 %v690_v52 }
 0x1b2   : > { %v1009_v53 = vpop.eup %1008 }
 0x1b3   : > { %v693_v54 = vsel %vm677_vm2, %v1009_v53, 0.0 }
 0x1b4   : > { %694 = vadd.xlane.f32.xlu1 %v693_v54 }
 0x21f   : > { %v692_v62 = vpop.xlane.xlu1 %691 }
 0x220   : > { %1010 = vrcp.f32 %v692_v62 }
 0x226   : > { %v1011_v63 = vpop.eup %1010 }
 0x227   : > { %v698_v0 = vmul.f32 %v1011_v63, %v1007_v50  ;;  %v695_v1 = vpop.xlane.xlu1 %694 }
 0x228   : > { %1012 = vrcp.f32 %v695_v1 }
 0x229   : > { %936 = vmatmul.msk.f32.vlgmr.msra.gmra.mxu0 %vm677_vm2, %v698_v0 }
 0x22e   : > { %v1013_v2 = vpop.eup %1012 }
 0x22f   : > { %v699_v3 = vmul.f32 %v1013_v2, %v1009_v53 }
 0x231   : > { %937 = vmatmul.msk.f32.vlgmr.msra.gmra.mxu1 %vm677_vm2, %v699_v3 }
 0x2a6   : > { %v720_v7 = vpop.f32.mrf.mxu0 }
 0x2a7   : > { %938 = vmatmul.msk.f32.vlgmr.msra.gmra.mxu2 %vm624_vm1, %v720_v7 }
 0x2ae   : > { %v743_v8 = vpop.f32.mrf.mxu1 }
 0x2af   : > { %939 = vmatmul.msk.f32.vlgmr.msra.gmra.mxu3 %vm624_vm1, %v743_v8 }
 0x32a   : > { %v770_v9 = vpop.f32.mrf.mxu2 }
 0x32b   : > { %v796_v12 = vsel %vm460_vm0, %v770_v9, 0.0 }
 0x332   : > { %v793_v10 = vpop.f32.mrf.mxu3 }
 0x333   : > { %v797_v13 = vsel %vm460_vm0, %v793_v10, 0.0 }
 0x334   : > { %v798_v14 = vadd.f32 %v797_v13, %v796_v12 }
 0x336   : > { %v803_v15 = vadd.f32 %v1005_v11, %v798_v14 }
 0x338   : > { %804 = vst.msk [vmem:[%s425_s15] sm:$0xff] %vm460_vm0, %v803_v15 }
 0x339   : > { %1041 = shalt.err (!%p1038_p5)
}
 0x33a   : > { %944 = dma.vmem_to_hbm [thread:$0]  (%p1194_p4), %s820_s16, 128, %s822_s23, %s806_s20  }
 0x33b PF: > { %p950_p6 = scmp.ge.s32.totalorder %s1092_s22, 2  ;;  %s833_s12 = sand.u32 1, %s1072_s17  }
 0x33c   : > { %s834_s13 = scalar_lea.sflag [#allocation3], %s833_s12 }
 0x33d   : > { %p947_p7 = pnand %p950_p6, %p1201_p8 }
 0x33f   : > { %p948_p9 = pneg %p947_p7 }
 0x341   : > { %1067 = dma.done.wait (%p948_p9), %s834_s13, 128  }
 0x342   : > { %1069 = vsyncadd (%p948_p9), %s834_s13, 4294967168  ;;  %s24_s22 = sadd.s32 1, %s1092_s22   ;;  %s1409_s14 = sld [smem:[#allocation5_spill]] }
 0x343   : > { %p21_p10 = scmp.ge.s32.totalorder %s24_s22, 4   ;;  %s1410_s19 = sld [smem:[#allocation8_spill]] }
 0x344   : > { %s1411_s20 = sld [smem:[#allocation6_spill]]  ;;  %s1413_s17 = smov %s1076_s18 }
 0x345   : > { %s1412_s21 = sld [smem:[#allocation7_spill]]  ;;  %23 = sbr.rel (!%p21_p10) target bundleno = 4 (0x4), region = 105 }
 0x348   : > { %s1414_s18 = smov %s1409_s14 }
 0x34a   :  { %840 = vsyncpa [#allocation3], 1 }
 0x34b   :  { %842 = vsyncpa [#allocation3 + $0x1], 1 }

</bundles_post_ra>
